<compile_context>
chip_gen: v7x
topology: tpu7x:2x2x1
jax: 0.10.0
libtpu: 0.0.40
codegen_flags: <defaults>
</compile_context>

<pallas_src>
import jax
import jax.numpy as jnp
from jax.experimental import pallas as pl
from jax.experimental.pallas import tpu as pltpu


_VMEM = pl.BlockSpec(memory_space=pltpu.MemorySpace.VMEM)


# ------------------------------ fused kernel -------------------------------

def vae_fused_kernel(x_ref, eps_ref,
                     w1_ref, b1_ref, wh_ref, bh_ref,
                     wd1_ref, bd1_ref, wd2_ref, bd2_ref,
                     mu_ref, std_ref, zs_ref, recon_ref):
    """Encoder -> rsample -> decoder, all resident in VMEM.

    Shapes (LP = latent dim padded to 128 lanes):
      x:   (B, D)        eps: (K*B, LP)
      w1:  (D, hidden)   wh:  (hidden, 2*LP)   [mu cols 0:L, logvar cols LP:LP+L]
      wd1: (LP, hidden)  wd2: (hidden, D)      (pad rows of wd1 are zero)
      outputs: mu/std (B, LP), zs (K*B, LP), recon (K*B, D)
    """
    B, LP = mu_ref.shape
    KB = zs_ref.shape[0]
    K = KB // B

    # ---- encoder ----
    x = x_ref[...].astype(jnp.bfloat16)
    h = jnp.maximum(
        jnp.dot(x, w1_ref[...], preferred_element_type=jnp.float32) + b1_ref[...],
        0.0)
    head = jnp.dot(h.astype(jnp.bfloat16), wh_ref[...],
                   preferred_element_type=jnp.float32) + bh_ref[...]   # (B, 2*LP)

    mu = head[:, :LP]                       # 128-lane aligned slice
    std = jnp.exp(0.5 * head[:, LP:])       # f32 exp on EUP
    mu_ref[...] = mu
    std_ref[...] = std

    # ---- reparameterized sample (broadcast over K inside VMEM) ----
    if K == 1:
        mu_kb, std_kb = mu, std
    else:
        mu_kb = jnp.broadcast_to(mu[None], (K, B, LP)).reshape(KB, LP)
        std_kb = jnp.broadcast_to(std[None], (K, B, LP)).reshape(KB, LP)
    z = mu_kb + std_kb * eps_ref[...]       # f32
    zs_ref[...] = z

    # ---- decoder ----
    hd = jnp.maximum(
        jnp.dot(z.astype(jnp.bfloat16), wd1_ref[...],
                preferred_element_type=jnp.float32) + bd1_ref[...],
        0.0)
    recon_ref[...] = jax.nn.sigmoid(
        jnp.dot(hd.astype(jnp.bfloat16), wd2_ref[...],
                preferred_element_type=jnp.float32) + bd2_ref[...])


# ------------------------------- parameters --------------------------------

def _round_up(n, m):
    return ((n + m - 1) // m) * m


def init_params(key, data_dim, hidden, n_latents):
    C, H, W = data_dim
    D = C * H * W
    LP = _round_up(max(n_latents, 128), 128)        # lane-dense latent width
    keys = jax.random.split(key, 5)
    s_in = 1.0 / jnp.sqrt(D)
    s_h = 1.0 / jnp.sqrt(hidden)
    s_l = 1.0 / jnp.sqrt(n_latents)

    w1 = (jax.random.normal(keys[0], (D, hidden), jnp.float32) * s_in
          ).astype(jnp.bfloat16)
    b1 = jnp.zeros((1, hidden), jnp.float32)

    wmu = jax.random.normal(keys[1], (hidden, n_latents), jnp.float32) * s_h
    wlv = jax.random.normal(keys[2], (hidden, n_latents), jnp.float32) * s_h
    wh = (jnp.zeros((hidden, 2 * LP), jnp.float32)
          .at[:, :n_latents].set(wmu)
          .at[:, LP:LP + n_latents].set(wlv)).astype(jnp.bfloat16)
    bh = jnp.zeros((1, 2 * LP), jnp.float32)

    wd1_raw = jax.random.normal(keys[3], (n_latents, hidden), jnp.float32) * s_l
    wd1 = (jnp.zeros((LP, hidden), jnp.float32)
           .at[:n_latents, :].set(wd1_raw)).astype(jnp.bfloat16)
    bd1 = jnp.zeros((1, hidden), jnp.float32)

    wd2 = (jax.random.normal(keys[4], (hidden, D), jnp.float32) * s_h
           ).astype(jnp.bfloat16)
    bd2 = jnp.zeros((1, D), jnp.float32)

    params = dict(w1=w1, b1=b1, wh=wh, bh=bh,
                  wd1=wd1, bd1=bd1, wd2=wd2, bd2=bd2,
                  n_latents=n_latents, lp=LP, data_dim=(C, H, W), hidden=hidden)
    # pz params (non-trainable zeros in the reference module)
    pz = (jnp.zeros((1, n_latents), jnp.float32),
          jnp.zeros((1, n_latents), jnp.float32))
    return params, pz


# ------------------------------- VAE wrapper -------------------------------

def vae_forward(x_nchw, params, rng_key, K=1):
    """Mirrors VAE.forward: returns (qz_x params, px_z params, zs)."""
    B, C, H, W = x_nchw.shape
    D = C * H * W
    L = params["n_latents"]
    LP = params["lp"]

    x_flat = x_nchw.reshape(B, D)                         # == torch .view(B, -1)
    # eps drawn lane-dense (K*B, LP); only the first L lanes reach the outputs
    # (pad rows of wd1 are zero, wrapper slices mu/std/zs back to L).
    eps = jax.random.normal(rng_key, (K * B, LP), jnp.float32)

    mu_p, std_p, zs_p, recon = pl.pallas_call(
        vae_fused_kernel,
        out_shape=(jax.ShapeDtypeStruct((B, LP), jnp.float32),
                   jax.ShapeDtypeStruct((B, LP), jnp.float32),
                   jax.ShapeDtypeStruct((K * B, LP), jnp.float32),
                   jax.ShapeDtypeStruct((K * B, D), jnp.float32)),
        in_specs=[_VMEM] * 10,
        out_specs=(_VMEM, _VMEM, _VMEM, _VMEM),
    )(x_flat, eps,
      params["w1"], params["b1"], params["wh"], params["bh"],
      params["wd1"], params["bd1"], params["wd2"], params["bd2"])

    mu = mu_p[:, :L]
    std = std_p[:, :L]
    zs = zs_p[:, :L].reshape(K, B, L)
    recon_mean = recon.reshape(K, B, C, H, W)             # px_z mean, NCHW
    px_scale = jnp.float32(0.75)                          # fixed likelihood scale
    return (mu, std), (recon_mean, px_scale), zs


def pz_params(pz):
    """Mirrors the pz_params property: (mu, softmax(logvar, dim=1) * n_latents)."""
    mu, lv = pz
    return mu, jax.nn.softmax(lv, axis=1) * lv.shape[-1]


# ---------------------------------- main -----------------------------------

if __name__ == "__main__":
    B, C, H, W = 2, 4, 16, 16
    n_latents = 32
    hidden = 128
    K = 1

    key = jax.random.PRNGKey(0)
    k_x, k_eps, k_w = jax.random.split(key, 3)

    x = jax.random.uniform(k_x, (B, C, H, W), jnp.float32)   # NCHW, in [0,1)
    params, pz = init_params(k_w, (C, H, W), hidden, n_latents)

    (mu, std), (recon_mean, scale), zs = vae_forward(x, params, k_eps, K=K)
    jax.block_until_ready((mu, std, recon_mean, zs))

    assert mu.shape == (B, n_latents) and std.shape == (B, n_latents)
    assert zs.shape == (K, B, n_latents)
    assert recon_mean.shape == (K, B, C, H, W)
    assert bool(jnp.all(std > 0))
    assert bool(jnp.all((recon_mean >= 0) & (recon_mean <= 1)))
    _ = pz_params(pz)

    print("KERNEL_OK")
</pallas_src>

<mosaic_0001>
module attributes {stable_mosaic.version = 11 : i64} {
  func.func @vae_fused_kernel(%arg0: memref<2x1024xf32, #tpu.memory_space<vmem>>, %arg1: memref<2x128xf32, #tpu.memory_space<vmem>>, %arg2: memref<1024x128xbf16, #tpu.memory_space<vmem>>, %arg3: memref<1x128xf32, #tpu.memory_space<vmem>>, %arg4: memref<128x256xbf16, #tpu.memory_space<vmem>>, %arg5: memref<1x256xf32, #tpu.memory_space<vmem>>, %arg6: memref<128x128xbf16, #tpu.memory_space<vmem>>, %arg7: memref<1x128xf32, #tpu.memory_space<vmem>>, %arg8: memref<128x1024xbf16, #tpu.memory_space<vmem>>, %arg9: memref<1x1024xf32, #tpu.memory_space<vmem>>, %arg10: memref<2x128xf32, #tpu.memory_space<vmem>>, %arg11: memref<2x128xf32, #tpu.memory_space<vmem>>, %arg12: memref<2x128xf32, #tpu.memory_space<vmem>>, %arg13: memref<2x1024xf32, #tpu.memory_space<vmem>>) attributes {dimension_semantics = [], scalar_prefetch = 0 : i64, scratch_operands = 0 : i64, tpu.core_type = #tpu.core_type<tc>} {
    %c0 = arith.constant 0 : index
    %c0_0 = arith.constant 0 : index
    %0 = vector.load %arg0[%c0, %c0_0] : memref<2x1024xf32, #tpu.memory_space<vmem>>, vector<2x1024xf32>
    %1 = arith.truncf %0 : vector<2x1024xf32> to vector<2x1024xbf16>
    %c0_1 = arith.constant 0 : index
    %c0_2 = arith.constant 0 : index
    %2 = vector.load %arg2[%c0_1, %c0_2] : memref<1024x128xbf16, #tpu.memory_space<vmem>>, vector<1024x128xbf16>
    %cst = arith.constant dense<0.000000e+00> : vector<2x128xf32>
    %3 = tpu.matmul %1, %2, %cst {dimension_numbers = #tpu.dot_dimension_numbers<[1], [0], [0], [1], [0, 0, 1, 1], [], []>} : vector<2x1024xbf16>, vector<1024x128xbf16>, vector<2x128xf32> -> vector<2x128xf32>
    %c0_3 = arith.constant 0 : index
    %c0_4 = arith.constant 0 : index
    %4 = vector.load %arg3[%c0_3, %c0_4] : memref<1x128xf32, #tpu.memory_space<vmem>>, vector<1x128xf32>
    %5 = vector.broadcast %4 : vector<1x128xf32> to vector<2x128xf32>
    %6 = arith.addf %3, %5 : vector<2x128xf32>
    %cst_5 = arith.constant 0.000000e+00 : f32
    %7 = vector.broadcast %cst_5 : f32 to vector<2x128xf32>
    %8 = arith.maximumf %6, %7 : vector<2x128xf32>
    %9 = arith.truncf %8 : vector<2x128xf32> to vector<2x128xbf16>
    %c0_6 = arith.constant 0 : index
    %c0_7 = arith.constant 0 : index
    %10 = vector.load %arg4[%c0_6, %c0_7] : memref<128x256xbf16, #tpu.memory_space<vmem>>, vector<128x256xbf16>
    %cst_8 = arith.constant dense<0.000000e+00> : vector<2x256xf32>
    %11 = tpu.matmul %9, %10, %cst_8 {dimension_numbers = #tpu.dot_dimension_numbers<[1], [0], [0], [1], [0, 0, 1, 1], [], []>} : vector<2x128xbf16>, vector<128x256xbf16>, vector<2x256xf32> -> vector<2x256xf32>
    %c0_9 = arith.constant 0 : index
    %c0_10 = arith.constant 0 : index
    %12 = vector.load %arg5[%c0_9, %c0_10] : memref<1x256xf32, #tpu.memory_space<vmem>>, vector<1x256xf32>
    %13 = vector.broadcast %12 : vector<1x256xf32> to vector<2x256xf32>
    %14 = arith.addf %11, %13 : vector<2x256xf32>
    %15 = vector.extract_strided_slice %14 {offsets = [0, 0], sizes = [2, 128], strides = [1, 1]} : vector<2x256xf32> to vector<2x128xf32>
    %16 = vector.extract_strided_slice %14 {offsets = [0, 128], sizes = [2, 128], strides = [1, 1]} : vector<2x256xf32> to vector<2x128xf32>
    %cst_11 = arith.constant 5.000000e-01 : f32
    %17 = vector.broadcast %cst_11 : f32 to vector<2x128xf32>
    %18 = arith.mulf %17, %16 : vector<2x128xf32>
    %19 = math.exp %18 : vector<2x128xf32>
    %c0_12 = arith.constant 0 : index
    %c0_13 = arith.constant 0 : index
    %20 = vector.load %arg10[%c0_12, %c0_13] : memref<2x128xf32, #tpu.memory_space<vmem>>, vector<2x128xf32>
    tpu.vector_store %arg10[%c0_12, %c0_13], %15 {strides = array<i32>} : memref<2x128xf32, #tpu.memory_space<vmem>>, vector<2x128xf32>,
    %c0_14 = arith.constant 0 : index
    %c0_15 = arith.constant 0 : index
    %21 = vector.load %arg11[%c0_14, %c0_15] : memref<2x128xf32, #tpu.memory_space<vmem>>, vector<2x128xf32>
    tpu.vector_store %arg11[%c0_14, %c0_15], %19 {strides = array<i32>} : memref<2x128xf32, #tpu.memory_space<vmem>>, vector<2x128xf32>,
    %c0_16 = arith.constant 0 : index
    %c0_17 = arith.constant 0 : index
    %22 = vector.load %arg1[%c0_16, %c0_17] : memref<2x128xf32, #tpu.memory_space<vmem>>, vector<2x128xf32>
    %23 = arith.mulf %19, %22 : vector<2x128xf32>
    %24 = arith.addf %15, %23 : vector<2x128xf32>
    %c0_18 = arith.constant 0 : index
    %c0_19 = arith.constant 0 : index
    %25 = vector.load %arg12[%c0_18, %c0_19] : memref<2x128xf32, #tpu.memory_space<vmem>>, vector<2x128xf32>
    tpu.vector_store %arg12[%c0_18, %c0_19], %24 {strides = array<i32>} : memref<2x128xf32, #tpu.memory_space<vmem>>, vector<2x128xf32>,
    %26 = arith.truncf %24 : vector<2x128xf32> to vector<2x128xbf16>
    %c0_20 = arith.constant 0 : index
    %c0_21 = arith.constant 0 : index
    %27 = vector.load %arg6[%c0_20, %c0_21] : memref<128x128xbf16, #tpu.memory_space<vmem>>, vector<128x128xbf16>
    %cst_22 = arith.constant dense<0.000000e+00> : vector<2x128xf32>
    %28 = tpu.matmul %26, %27, %cst_22 {dimension_numbers = #tpu.dot_dimension_numbers<[1], [0], [0], [1], [0, 0, 1, 1], [], []>} : vector<2x128xbf16>, vector<128x128xbf16>, vector<2x128xf32> -> vector<2x128xf32>
    %c0_23 = arith.constant 0 : index
    %c0_24 = arith.constant 0 : index
    %29 = vector.load %arg7[%c0_23, %c0_24] : memref<1x128xf32, #tpu.memory_space<vmem>>, vector<1x128xf32>
    %30 = vector.broadcast %29 : vector<1x128xf32> to vector<2x128xf32>
    %31 = arith.addf %28, %30 : vector<2x128xf32>
    %cst_25 = arith.constant 0.000000e+00 : f32
    %32 = vector.broadcast %cst_25 : f32 to vector<2x128xf32>
    %33 = arith.maximumf %31, %32 : vector<2x128xf32>
    %34 = arith.truncf %33 : vector<2x128xf32> to vector<2x128xbf16>
    %c0_26 = arith.constant 0 : index
    %c0_27 = arith.constant 0 : index
    %35 = vector.load %arg8[%c0_26, %c0_27] : memref<128x1024xbf16, #tpu.memory_space<vmem>>, vector<128x1024xbf16>
    %cst_28 = arith.constant dense<0.000000e+00> : vector<2x1024xf32>
    %36 = tpu.matmul %34, %35, %cst_28 {dimension_numbers = #tpu.dot_dimension_numbers<[1], [0], [0], [1], [0, 0, 1, 1], [], []>} : vector<2x128xbf16>, vector<128x1024xbf16>, vector<2x1024xf32> -> vector<2x1024xf32>
    %c0_29 = arith.constant 0 : index
    %c0_30 = arith.constant 0 : index
    %37 = vector.load %arg9[%c0_29, %c0_30] : memref<1x1024xf32, #tpu.memory_space<vmem>>, vector<1x1024xf32>
    %38 = vector.broadcast %37 : vector<1x1024xf32> to vector<2x1024xf32>
    %39 = arith.addf %36, %38 : vector<2x1024xf32>
    %40 = arith.negf %39 : vector<2x1024xf32>
    %41 = math.exp %40 : vector<2x1024xf32>
    %cst_31 = arith.constant 1.000000e+00 : f32
    %42 = vector.broadcast %cst_31 : f32 to vector<2x1024xf32>
    %43 = arith.addf %42, %41 : vector<2x1024xf32>
    %44 = arith.divf %42, %43 : vector<2x1024xf32>
    %c0_32 = arith.constant 0 : index
    %c0_33 = arith.constant 0 : index
    %45 = vector.load %arg13[%c0_32, %c0_33] : memref<2x1024xf32, #tpu.memory_space<vmem>>, vector<2x1024xf32>
    tpu.vector_store %arg13[%c0_32, %c0_33], %44 {strides = array<i32>} : memref<2x1024xf32, #tpu.memory_space<vmem>>, vector<2x1024xf32>,
    return
  }
}

</mosaic_0001>

<bundles_post_ra>
// kernel: tpu_custom_call.1
= control target key start
LH: loop header
LB: loop body
LE: loop exit
PB: predicated region body
PF: predicated region fallthrough
CT: control target
= control target key end

     0   :  { %19 = vsyncpa [#allocation3], 0  ;;  %s2761_s0 = inlined_call_operand.hbm [shape: f32[2,1024], index: 0, kind: input, shape index: {}]   ;;  %s2762_s1 = inlined_call_operand.vmem [shape: f32[2,128], index: 1, kind: input, shape index: {}]   ;;  %s2763_s2 = inlined_call_operand.hbm [shape: bf16[1024,128], index: 2, kind: input, shape index: {}]   ;;  %s2764_s3 = inlined_call_operand.vmem [shape: f32[1,128], index: 3, kind: input, shape index: {}]   ;;  %s2765_s4 = inlined_call_operand.hbm [shape: bf16[128,256], index: 4, kind: input, shape index: {}]   ;;  %s2766_s5 = inlined_call_operand.vmem [shape: f32[1,256], index: 5, kind: input, shape index: {}]   ;;  %s2767_s6 = inlined_call_operand.hbm [shape: bf16[128,128], index: 6, kind: input, shape index: {}]   ;;  %s2768_s7 = inlined_call_operand.vmem [shape: f32[1,128], index: 7, kind: input, shape index: {}]   ;;  %s2769_s8 = inlined_call_operand.hbm [shape: bf16[128,1024], index: 8, kind: input, shape index: {}]   ;;  %s2770_s9 = inlined_call_operand.vmem [shape: f32[1,1024], index: 9, kind: input, shape index: {}]   ;;  %s2771_s10 = inlined_call_operand.hbm [shape: f32[2,128], index: 10, kind: output, shape index: {0}]   ;;  %s2772_s11 = inlined_call_operand.hbm [shape: f32[2,128], index: 11, kind: output, shape index: {1}]   ;;  %s2773_s12 = inlined_call_operand.hbm [shape: f32[2,128], index: 12, kind: output, shape index: {2}]   ;;  %s2774_s13 = inlined_call_operand.hbm [shape: f32[2,1024], index: 13, kind: output, shape index: {3}]  }
   0x1   :  { %20 = vsyncpa [#allocation6], 0 }
   0x2   :  { %21 = vsyncpa [#allocation9], 0 }
   0x3   :  { %22 = vsyncpa [#allocation4], 0 }
   0x4   :  { %23 = vsyncpa [#allocation13], 0 }
   0x5   :  { %24 = vsyncpa [#allocation16], 0  ;;  %s2498_s25 = smov [#allocation5]   ;;  %s2288_s29 = scalar_lea.hbm %s2763_s2, 8192 }
   0x6   :  { %s42_s26 = sshll.u32 %s2498_s25, 4  ;;  %p2289_p0 = scmp.ne.s32.totalorder %s2763_s2, %s2288_s29  ;;  %s43_s26 = int_to_ptr.vmem [resolvable:$true] %s42_s26 }
   0x7   :  { %p2292_p1 = scmp.lt.u32.totalorder %s2288_s29, %s2763_s2 }
   0x9   :  { %p2294_p2 = pnand %p2292_p1, %p2289_p0 }
   0xb   :  { %2297 = shalt.err (!%p2294_p2)
}
   0xc   :  { %s2298_s17 = scalar_lea.vmem %s43_s26, 8192  ;;  %p2303_p4 = scmp.lt.s32.totalorder %s43_s26, %s43_s26 }
   0xd   :  { %p2299_p3 = scmp.ne.s32.totalorder %s43_s26, %s2298_s17  ;;  %p2304_p5 = scmp.lt.s32.totalorder %s2298_s17, %s2298_s17 }
   0xf   :  { %p2305_p6 = por %p2304_p5, %p2303_p4 }
  0x11   :  { %p2306_p7 = pnand %p2305_p6, %p2299_p3 }
  0x13   :  { %2309 = shalt.err (!%p2306_p7)
}
  0x14   :  { %s2499_s18 = smov 64   ;;  %s2500_s19 = smov 4  }
  0x15   :  { %48 = dma.hbm_to_vmem [thread:$0]  %s2763_s2, 8192, %s43_s26, [#allocation6], %s2499_s18, %s2499_s18, %s2500_s19  }
  0x16   :  { %s2501_s22 = smov [#allocation8]   ;;  %s2502_s24 = smov [#allocation2]  }
  0x17   :  { %s70_s23 = sshll.u32 %s2501_s22, 4  ;;  %s31_s25 = sshll.u32 %s2502_s24, 4  ;;  %s71_s23 = int_to_ptr.vmem [resolvable:$true] %s70_s23  ;;  %s32_s25 = int_to_ptr.vmem [resolvable:$true] %s31_s25 }
  0x18   :  { %s2310_s29 = scalar_lea.hbm %s2767_s6, 1024 }
  0x19   :  { %p2311_p8 = scmp.ne.s32.totalorder %s2767_s6, %s2310_s29  ;;  %p2314_p9 = scmp.lt.u32.totalorder %s2310_s29, %s2767_s6 }
  0x1b   :  { %p2316_p10 = pnand %p2314_p9, %p2311_p8 }
  0x1d   :  { %2319 = shalt.err (!%p2316_p10)
}
  0x1e   :  { %s2320_s2 = scalar_lea.vmem %s71_s23, 1024  ;;  %p2325_p12 = scmp.lt.s32.totalorder %s71_s23, %s71_s23 }
  0x1f   :  { %p2321_p11 = scmp.ne.s32.totalorder %s71_s23, %s2320_s2  ;;  %p2326_p13 = scmp.lt.s32.totalorder %s2320_s2, %s2320_s2 }
  0x21   :  { %p2327_p0 = por %p2326_p13, %p2325_p12 }
  0x23   :  { %p2328_p1 = pnand %p2327_p0, %p2321_p11 }
  0x25   :  { %2331 = shalt.err (!%p2328_p1)
}
  0x26   :  { %76 = dma.hbm_to_vmem [thread:$0]  %s2767_s6, 1024, %s71_s23, [#allocation9], %s2499_s18, %s2499_s18, %s2500_s19  }
  0x27   :  { %s2332_s22 = scalar_lea.hbm %s2761_s0, 256 }
  0x28   :  { %p2333_p2 = scmp.ne.s32.totalorder %s2761_s0, %s2332_s22  ;;  %p2336_p3 = scmp.lt.u32.totalorder %s2332_s22, %s2761_s0 }
  0x2a   :  { %p2338_p4 = pnand %p2336_p3, %p2333_p2 }
  0x2c   :  { %2341 = shalt.err (!%p2338_p4)
}
  0x2d   :  { %s2342_s30 = scalar_lea.vmem %s32_s25, 256  ;;  %p2347_p6 = scmp.lt.s32.totalorder %s32_s25, %s32_s25 }
  0x2e   :  { %p2343_p5 = scmp.ne.s32.totalorder %s32_s25, %s2342_s30  ;;  %p2348_p7 = scmp.lt.s32.totalorder %s2342_s30, %s2342_s30 }
  0x30   :  { %p2349_p8 = por %p2348_p7, %p2347_p6 }
  0x32   :  { %p2350_p9 = pnand %p2349_p8, %p2343_p5 }
  0x34   :  { %2353 = shalt.err (!%p2350_p9)
}
  0x35   :  { %34 = dma.hbm_to_vmem [thread:$0]  %s2761_s0, 256, %s32_s25, [#allocation3]  }
  0x36   :  { %s2503_s19 = smov [#allocation7]   ;;  %s2354_s16 = scalar_lea.hbm %s2765_s4, 2048 }
  0x37   :  { %s56_s23 = sshll.u32 %s2503_s19, 4  ;;  %p2355_p10 = scmp.ne.s32.totalorder %s2765_s4, %s2354_s16  ;;  %s57_s23 = int_to_ptr.vmem [resolvable:$true] %s56_s23 }
  0x38   :  { %p2358_p11 = scmp.lt.u32.totalorder %s2354_s16, %s2765_s4 }
  0x3a   :  { %p2360_p12 = pnand %p2358_p11, %p2355_p10 }
  0x3c   :  { %2363 = shalt.err (!%p2360_p12)
}
  0x3d   :  { %s2364_s21 = scalar_lea.vmem %s57_s23, 2048  ;;  %p2369_p0 = scmp.lt.s32.totalorder %s57_s23, %s57_s23 }
  0x3e   :  { %p2365_p13 = scmp.ne.s32.totalorder %s57_s23, %s2364_s21  ;;  %p2370_p1 = scmp.lt.s32.totalorder %s2364_s21, %s2364_s21 }
  0x40   :  { %p2371_p2 = por %p2370_p1, %p2369_p0 }
  0x42   :  { %p2372_p3 = pnand %p2371_p2, %p2365_p13 }
  0x44   :  { %2375 = shalt.err (!%p2372_p3)
}
  0x45   :  { %s2504_s0 = smov 128   ;;  %s2505_s25 = smov 8  }
  0x46   :  { %62 = dma.hbm_to_vmem [thread:$0]  %s2765_s4, 2048, %s57_s23, [#allocation6], %s2504_s0, %s2504_s0, %s2505_s25  }
  0x47   :  { %s2506_s27 = smov [#allocation10]   ;;  %s2376_s6 = scalar_lea.hbm %s2769_s8, 8192 }
  0x48   :  { %s84_s28 = sshll.u32 %s2506_s27, 4  ;;  %p2377_p4 = scmp.ne.s32.totalorder %s2769_s8, %s2376_s6  ;;  %s85_s28 = int_to_ptr.vmem [resolvable:$true] %s84_s28 }
  0x49   :  { %p2380_p5 = scmp.lt.u32.totalorder %s2376_s6, %s2769_s8 }
  0x4b   :  { %p2382_p6 = pnand %p2380_p5, %p2377_p4 }
  0x4d   :  { %2385 = shalt.err (!%p2382_p6)
}
  0x4e   :  { %s2386_s16 = scalar_lea.vmem %s85_s28, 8192  ;;  %p2391_p8 = scmp.lt.s32.totalorder %s85_s28, %s85_s28 }
  0x4f   :  { %p2387_p7 = scmp.ne.s32.totalorder %s85_s28, %s2386_s16  ;;  %p2392_p9 = scmp.lt.s32.totalorder %s2386_s16, %s2386_s16 }
  0x51   :  { %p2393_p10 = por %p2392_p9, %p2391_p8 }
  0x53   :  { %p2394_p11 = pnand %p2393_p10, %p2387_p7 }
  0x55   :  { %2397 = shalt.err (!%p2394_p11)
}
  0x56   :  { %s2507_s4 = smov 512   ;;  %s2508_s23 = smov 32  }
  0x57   :  { %90 = dma.hbm_to_vmem [thread:$0]  %s2769_s8, 8192, %s85_s28, [#allocation9], %s2507_s4, %s2507_s4, %s2508_s23  }
  0x58   :  { %2486 = dma.done.wait [#allocation3], 256  }
  0x59   :  { %2487 = vsyncadd [#allocation3], 4294967040 }
  0x5a   :  { %2488 = dma.done.wait [#allocation6], 10240  }
  0x5b   :  { %2489 = vsyncadd [#allocation6], 4294957056 }
  0x5c   :  { %2490 = dma.done.wait [#allocation9], 9216  }
  0x5d   :  { %2491 = vsyncadd [#allocation9], 4294958080  ;;  %v2156_v0 = vld [vmem:[#allocation5 + $0x40] sm:$0xff]   ;;  %v2160_v4 = vld [vmem:[#allocation5 + $0x48] sm:$0xff]   ;;  %v2509_v22 = vmov 1983009808   ;;  %v117_v24 = vlaneseq }
  0x5e   :  { %v2157_v1 = vld [vmem:[#allocation5 + $0xc0] sm:$0xff]   ;;  %2020 = vmatprep.subr.bf16.mxu0 %v2156_v0  ;;  %v2161_v5 = vld [vmem:[#allocation5 + $0xc8] sm:$0xff]   ;;  %v2164_v8 = vld [vmem:[#allocation5 + $0x50] sm:$0xff]   ;;  %v115_v23 = vunpack.c.l.s4 %v2509_v22  ;;  %vm2512_vm0 = vmmov 0   ;;  %s2514_s22 = smov [#allocation11]  }
  0x5f   :  { %v2158_v2 = vld [vmem:[#allocation5] sm:$0xff]   ;;  %2042 = vmatprep.subr.bf16.mxu1 %v2157_v1  ;;  %v2162_v6 = vld [vmem:[#allocation5 + $0x8] sm:$0xff]   ;;  %v2165_v9 = vld [vmem:[#allocation5 + $0xd0] sm:$0xff]   ;;  %v2647_v30 = vshrl.u32 %v117_v24, 7  ;;  %s1806_s24 = sshll.u32 %s2514_s22, 4  ;;  %s1807_s24 = int_to_ptr.vmem [resolvable:$true] %s1806_s24 }
  0x60   :  { %v2159_v3 = vld [vmem:[#allocation5 + $0x80] sm:$0xff]   ;;  %2021 = vmatpush3.bf16.msra.mxu0 %v2158_v2  ;;  %v2163_v7 = vld [vmem:[#allocation5 + $0x88] sm:$0xff]   ;;  %v2166_v10 = vld [vmem:[#allocation5 + $0x10] sm:$0xff]   ;;  %v116_v29 = vunpack.c.0.s8 %v115_v23 }
  0x61   :  { %2043 = vmatpush3.bf16.msra.mxu1 %v2159_v3  ;;  %2022 = vmatprep.subr.bf16.mxu0 %v2160_v4  ;;  %v2167_v11 = vld [vmem:[#allocation5 + $0x90] sm:$0xff]   ;;  %v2168_v12 = vld [vmem:[#allocation5 + $0x58] sm:$0xff]   ;;  %v2172_v16 = vld [vmem:[#allocation5 + $0x60] sm:$0xff]  }
  0x62   :  { %2044 = vmatprep.subr.bf16.mxu1 %v2161_v5  ;;  %v2169_v13 = vld [vmem:[#allocation5 + $0xd8] sm:$0xff]   ;;  %v2173_v17 = vld [vmem:[#allocation5 + $0xe0] sm:$0xff]   ;;  %v2176_v20 = vld [vmem:[#allocation5 + $0x68] sm:$0xff]   ;;  %v2650_v35 = vsub.s32 %v116_v29, %v2647_v30 }
  0x63   :  { %v2170_v14 = vld [vmem:[#allocation5 + $0x18] sm:$0xff]   ;;  %v2174_v18 = vld [vmem:[#allocation5 + $0x20] sm:$0xff]   ;;  %v2177_v21 = vld [vmem:[#allocation5 + $0xe8] sm:$0xff]  }
  0x64   :  { %2023 = vmatpush3.bf16.msra.mxu0 %v2162_v6  ;;  %v2171_v15 = vld [vmem:[#allocation5 + $0x98] sm:$0xff]   ;;  %v2175_v19 = vld [vmem:[#allocation5 + $0xa0] sm:$0xff]   ;;  %v2178_v25 = vld [vmem:[#allocation5 + $0x28] sm:$0xff]  }
  0x65   :  { %2045 = vmatpush3.bf16.msra.mxu1 %v2163_v7  ;;  %2024 = vmatprep.subr.bf16.mxu0 %v2164_v8  ;;  %v2179_v26 = vld [vmem:[#allocation5 + $0xa8] sm:$0xff]   ;;  %v2180_v27 = vld [vmem:[#allocation5 + $0x70] sm:$0xff]   ;;  %v2184_v33 = vld [vmem:[#allocation5 + $0x78] sm:$0xff]  }
  0x66   :  { %2046 = vmatprep.subr.bf16.mxu1 %v2165_v9  ;;  %v2181_v28 = vld [vmem:[#allocation5 + $0xf0] sm:$0xff]   ;;  %v2185_v34 = vld [vmem:[#allocation5 + $0xf8] sm:$0xff]   ;;  %v2189_v41 = vld [vmem:[#allocation5 + $0x140] sm:$0xff]  }
  0x67   :  { %v2182_v31 = vld [vmem:[#allocation5 + $0x30] sm:$0xff]   ;;  %v2186_v36 = vld [vmem:[#allocation5 + $0x38] sm:$0xff]   ;;  %v2190_v42 = vld [vmem:[#allocation5 + $0x1c0] sm:$0xff]  }
  0x68   :  { %2025 = vmatpush3.bf16.msra.mxu0 %v2166_v10  ;;  %v2183_v32 = vld [vmem:[#allocation5 + $0xb0] sm:$0xff]   ;;  %v2187_v37 = vld [vmem:[#allocation5 + $0xb8] sm:$0xff]   ;;  %v2191_v46 = vld [vmem:[#allocation5 + $0x100] sm:$0xff]  }
  0x69   :  { %2047 = vmatpush3.bf16.msra.mxu1 %v2167_v11  ;;  %2026 = vmatprep.subr.bf16.mxu0 %v2168_v12  ;;  %v109_v38 = vld [vmem:[#allocation2] sm:$0xff]  ;;  %v2192_v49 = vld [vmem:[#allocation5 + $0x180] sm:$0xff]   ;;  %v2193_v51 = vld [vmem:[#allocation5 + $0x148] sm:$0xff]  }
  0x6a   :  { %2048 = vmatprep.subr.bf16.mxu1 %v2169_v13  ;;  %v120_v39 = vrot.slane %v109_v38, %v2650_v35  ;;  %v113_v40 = vcombine.high %v109_v38, %v109_v38  ;;  %v2194_v53 = vld [vmem:[#allocation5 + $0x1c8] sm:$0xff]   ;;  %v2197_v56 = vld [vmem:[#allocation5 + $0x150] sm:$0xff]   ;;  %v2201_v60 = vld [vmem:[#allocation5 + $0x158] sm:$0xff]  }
  0x6b   :  { %v2195_v54 = vld [vmem:[#allocation5 + $0x108] sm:$0xff]   ;;  %v2198_v57 = vld [vmem:[#allocation5 + $0x1d0] sm:$0xff]   ;;  %v2202_v61 = vld [vmem:[#allocation5 + $0x1d8] sm:$0xff]  }
  0x6c   :  { %2027 = vmatpush3.bf16.msra.mxu0 %v2170_v14  ;;  %v128_v43 = vcombine.high %v120_v39, %v120_v39  ;;  %v127_v44 = vrot.slane %v113_v40, %v2650_v35  ;;  %v155_v45 = vpack.c.bf16 %v120_v39, %v120_v39  ;;  %v2196_v55 = vld [vmem:[#allocation5 + $0x188] sm:$0xff]   ;;  %v2199_v58 = vld [vmem:[#allocation5 + $0x110] sm:$0xff]   ;;  %v2203_v62 = vld [vmem:[#allocation5 + $0x118] sm:$0xff]  }
  0x6d   :  { %2049 = vmatpush3.bf16.msra.mxu1 %v2171_v15  ;;  %2028 = vmatprep.subr.bf16.mxu0 %v2172_v16  ;;  %v2200_v59 = vld [vmem:[#allocation5 + $0x190] sm:$0xff]   ;;  %v2204_v63 = vld [vmem:[#allocation5 + $0x198] sm:$0xff]   ;;  %v2205_v0 = vld [vmem:[#allocation5 + $0x160] sm:$0xff]  }
  0x6e   :  { %2050 = vmatprep.subr.bf16.mxu1 %v2173_v17  ;;  %v156_v47 = vpack.c.bf16 %v128_v43, %v128_v43  ;;  %v129_v48 = vcombine.high %v127_v44, %v127_v44  ;;  %v157_v50 = vpack.c.bf16 %v127_v44, %v127_v44  ;;  %v2206_v1 = vld [vmem:[#allocation5 + $0x1e0] sm:$0xff]   ;;  %v2209_v4 = vld [vmem:[#allocation5 + $0x168] sm:$0xff]   ;;  %v2213_v8 = vld [vmem:[#allocation5 + $0x170] sm:$0xff]   ;;  %v2510_v44 = vmov 0  }
  0x6f   :  { %v2207_v2 = vld [vmem:[#allocation5 + $0x120] sm:$0xff]   ;;  %v2210_v5 = vld [vmem:[#allocation5 + $0x1e8] sm:$0xff]   ;;  %v2214_v9 = vld [vmem:[#allocation5 + $0x1f0] sm:$0xff]  }
  0x70   :  { %2029 = vmatpush3.bf16.msra.mxu0 %v2174_v18  ;;  %714 = vmatprep.mubr.bf16.mxu0 %v156_v47  ;;  %v158_v52 = vpack.c.bf16 %v129_v48, %v129_v48  ;;  %v2208_v3 = vld [vmem:[#allocation5 + $0x1a0] sm:$0xff]   ;;  %v2211_v6 = vld [vmem:[#allocation5 + $0x128] sm:$0xff]   ;;  %v2215_v10 = vld [vmem:[#allocation5 + $0x130] sm:$0xff]  }
  0x71   :  { %2051 = vmatpush3.bf16.msra.mxu1 %v2175_v19  ;;  %2030 = vmatprep.subr.bf16.mxu0 %v2176_v20  ;;  %v2212_v7 = vld [vmem:[#allocation5 + $0x1a8] sm:$0xff]   ;;  %v2216_v11 = vld [vmem:[#allocation5 + $0x1b0] sm:$0xff]   ;;  %v2217_v12 = vld [vmem:[#allocation5 + $0x178] sm:$0xff]  }
  0x72   :  { %2052 = vmatprep.subr.bf16.mxu1 %v2177_v21  ;;  %754 = vmatprep.mubr.bf16.mxu1 %v158_v52  ;;  %v2218_v13 = vld [vmem:[#allocation5 + $0x1f8] sm:$0xff]   ;;  %v2242_v40 = vld [vmem:[#allocation7 + $0x64] ss:$8 sps:$4 sm:$0xff]  }
  0x73   :  { %v2219_v14 = vld [vmem:[#allocation5 + $0x138] sm:$0xff]   ;;  %v2247_v47 = vld [vmem:[#allocation8 + $0x8] sm:$0xff]  }
  0x74   :  { %2031 = vmatpush3.bf16.msra.mxu0 %v2178_v25  ;;  %v110_v15 = vld [vmem:[#allocation2 + $0x8] sm:$0xff] }
  0x75   :  { %2053 = vmatpush3.bf16.msra.mxu1 %v2179_v26  ;;  %2032 = vmatprep.subr.bf16.mxu0 %v2180_v27  ;;  %v2220_v16 = vld [vmem:[#allocation5 + $0x1b8] sm:$0xff]   ;;  %v137_v17 = vrot.slane %v110_v15, %v2650_v35  ;;  %v130_v18 = vcombine.high %v110_v15, %v110_v15  ;;  %v2222_v26 = vld [vmem:[#allocation7] ss:$8 sps:$4 sm:$0xff]   ;;  %v2224_v27 = vld [vmem:[#allocation7 + $0x4] ss:$8 sps:$4 sm:$0xff]  }
  0x76   :  { %2054 = vmatprep.subr.bf16.mxu1 %v2181_v28  ;;  %v2227_v28 = vld [vmem:[#allocation7 + $0x14] ss:$8 sps:$4 sm:$0xff]   ;;  %v2225_v29 = vld [vmem:[#allocation7 + $0x10] ss:$8 sps:$4 sm:$0xff]  }
  0x77   :  { %v145_v19 = vcombine.high %v137_v17, %v137_v17  ;;  %v144_v20 = vrot.slane %v130_v18, %v2650_v35  ;;  %v159_v21 = vpack.c.bf16 %v137_v17, %v137_v17  ;;  %v2239_v38 = vld [vmem:[#allocation7 + $0x54] ss:$8 sps:$4 sm:$0xff]   ;;  %v2237_v39 = vld [vmem:[#allocation7 + $0x50] ss:$8 sps:$4 sm:$0xff]   ;;  %v1116_v17 = vld [vmem:[#allocation10] sm:$0xff] }
  0x78   :  { %2033 = vmatpush3.bf16.msra.mxu0 %v2182_v31  ;;  %v2230_v31 = vld [vmem:[#allocation7 + $0x24] ss:$8 sps:$4 sm:$0xff]   ;;  %v2243_v43 = vld [vmem:[#allocation7 + $0x70] ss:$8 sps:$4 sm:$0xff]  }
  0x79   :  { %2055 = vmatpush3.bf16.msra.mxu1 %v2183_v32  ;;  %2034 = vmatprep.subr.bf16.mxu0 %v2184_v33  ;;  %v160_v22 = vpack.c.bf16 %v145_v19, %v145_v19  ;;  %v146_v23 = vcombine.high %v144_v20, %v144_v20  ;;  %v161_v24 = vpack.c.bf16 %v144_v20, %v144_v20  ;;  %v2228_v32 = vld [vmem:[#allocation7 + $0x20] ss:$8 sps:$4 sm:$0xff]   ;;  %v2233_v33 = vld [vmem:[#allocation7 + $0x34] ss:$8 sps:$4 sm:$0xff]  }
  0x7a   :  { %2056 = vmatprep.subr.bf16.mxu1 %v2185_v34  ;;  %v2231_v34 = vld [vmem:[#allocation7 + $0x30] ss:$8 sps:$4 sm:$0xff]   ;;  %v1120_v18 = vld [vmem:[#allocation10 + $0x20] sm:$0xff]  ;;  %v2661_v19 = vld [vmem:[#allocation10 + $0x8] sm:$0xff] }
  0x7b   :  { %v162_v25 = vpack.c.bf16 %v146_v23, %v146_v23  ;;  %v2252_v15 = vld [vmem:[#allocation8 + $0x30] sm:$0xff]   ;;  %v1948_v20 = vcombine.low %v1116_v17, %v1120_v18  ;;  %v1124_v23 = vld [vmem:[#allocation10 + $0x40] sm:$0xff] }
  0x7c   :  { %2035 = vmatpush3.bf16.msra.mxu0 %v2186_v36  ;;  %v2236_v36 = vld [vmem:[#allocation7 + $0x44] ss:$8 sps:$4 sm:$0xff]  }
  0x7d   :  { %2057 = vmatpush3.bf16.msra.mxu1 %v2187_v37  ;;  %2064 = vmatprep.subr.bf16.mxu0 %v2189_v41  ;;  %v2234_v37 = vld [vmem:[#allocation7 + $0x40] ss:$8 sps:$4 sm:$0xff]  }
  0x7e   :  { %2086 = vmatprep.subr.bf16.mxu1 %v2190_v42  ;;  %v2240_v41 = vld [vmem:[#allocation7 + $0x60] ss:$8 sps:$4 sm:$0xff]   ;;  %v2245_v42 = vld [vmem:[#allocation7 + $0x74] ss:$8 sps:$4 sm:$0xff]  }
  0x7f   :  { %715 = vmatmul.mubr.bf16.vlgmr.msra.gmra.mrb[0].mxu0 %v155_v45  ;;  %v2246_v45 = vld [vmem:[#allocation8] sm:$0xff]  }
  0x80   :  { %2065 = vmatpush3.bf16.msra.mxu0 %v2191_v46  ;;  %755 = vmatmul.mubr.bf16.vlgmr.msra.gmra.mrb[0].mxu1 %v157_v50  ;;  %v2511_v46 = vmov 0.0  }
  0x81   :  { %2066 = vmatprep.subr.bf16.mxu0 %v2193_v51  ;;  %2087 = vmatpush3.bf16.msra.mxu1 %v2192_v49  ;;  %v1858_v49 = vld [vmem:[%s2764_s3] ss:$0 sm:$0xff] }
  0x82   :  { %2088 = vmatprep.subr.bf16.mxu1 %v2194_v53  ;;  %794 = vmatprep.mubr.bf16.mxu0 %v160_v22  ;;  %v2663_v22 = vld [vmem:[#allocation10 + $0x28] sm:$0xff] }
  0x83   :  { %834 = vmatprep.mubr.bf16.mxu1 %v162_v25  ;;  %v1950_v25 = vcombine.low %v2661_v19, %v2663_v22 }
  0x84   :  { %2067 = vmatpush3.bf16.msra.mxu0 %v2195_v54 }
  0x85   :  { %2068 = vmatprep.subr.bf16.mxu0 %v2197_v56  ;;  %2089 = vmatpush3.bf16.msra.mxu1 %v2196_v55 }
  0x86   :  { %2090 = vmatprep.subr.bf16.mxu1 %v2198_v57 }
  0x88   :  { %2069 = vmatpush3.bf16.msra.mxu0 %v2199_v58 }
  0x89   :  { %2070 = vmatprep.subr.bf16.mxu0 %v2201_v60  ;;  %2091 = vmatpush3.bf16.msra.mxu1 %v2200_v59 }
  0x8a   :  { %2092 = vmatprep.subr.bf16.mxu1 %v2202_v61 }
  0x8c   :  { %2071 = vmatpush3.bf16.msra.mxu0 %v2203_v62 }
  0x8d   :  { %2072 = vmatprep.subr.bf16.mxu0 %v2205_v0  ;;  %2093 = vmatpush3.bf16.msra.mxu1 %v2204_v63 }
  0x8e   :  { %2094 = vmatprep.subr.bf16.mxu1 %v2206_v1 }
  0x90   :  { %2073 = vmatpush3.bf16.msra.mxu0 %v2207_v2 }
  0x91   :  { %2074 = vmatprep.subr.bf16.mxu0 %v2209_v4  ;;  %2095 = vmatpush3.bf16.msra.mxu1 %v2208_v3 }
  0x92   :  { %2096 = vmatprep.subr.bf16.mxu1 %v2210_v5 }
  0x94   :  { %2075 = vmatpush3.bf16.msra.mxu0 %v2211_v6 }
  0x95   :  { %2076 = vmatprep.subr.bf16.mxu0 %v2213_v8  ;;  %2097 = vmatpush3.bf16.msra.mxu1 %v2212_v7 }
  0x96   :  { %2098 = vmatprep.subr.bf16.mxu1 %v2214_v9 }
  0x98   :  { %2077 = vmatpush3.bf16.msra.mxu0 %v2215_v10 }
  0x99   :  { %2078 = vmatprep.subr.bf16.mxu0 %v2217_v12  ;;  %2099 = vmatpush3.bf16.msra.mxu1 %v2216_v11  ;;  %v2248_v11 = vld [vmem:[#allocation8 + $0x10] sm:$0xff]   ;;  %v2249_v12 = vld [vmem:[#allocation8 + $0x18] sm:$0xff]  }
  0x9a   :  { %2100 = vmatprep.subr.bf16.mxu1 %v2218_v13  ;;  %v2250_v13 = vld [vmem:[#allocation8 + $0x20] sm:$0xff]  }
  0x9c   :  { %2079 = vmatpush3.bf16.msra.mxu0 %v2219_v14  ;;  %v2251_v14 = vld [vmem:[#allocation8 + $0x28] sm:$0xff]  }
  0x9d   :  { %2101 = vmatpush3.bf16.msra.mxu1 %v2220_v16  ;;  %952 = vmatprep.subr.bf16.mxu0 %v2224_v27  ;;  %v2253_v16 = vld [vmem:[#allocation8 + $0x38] sm:$0xff]  }
  0x9e   :  { %2117 = vmatprep.subr.bf16.mxu1 %v2511_v46 }
  0x9f   :  { %795 = vmatmul.mubr.bf16.vlgmr.msra.gmra.mrb[4].mxu0 %v159_v21  ;;  %v1949_v21 = vcombine.high %v1116_v17, %v1120_v18  ;;  %v1149_v17 = vld [vmem:[#allocation10 + $0x108] sm:$0xff] }
  0xa0   :  { %835 = vmatmul.mubr.bf16.vlgmr.msra.gmra.mrb[4].mxu1 %v161_v24  ;;  %953 = vmatpush1.bf16.msra.mxu0 %v2222_v26  ;;  %v1128_v24 = vld [vmem:[#allocation10 + $0x60] sm:$0xff]  ;;  %v1951_v26 = vcombine.high %v2661_v19, %v2663_v22  ;;  %v1153_v18 = vld [vmem:[#allocation10 + $0x128] sm:$0xff] }
  0xa1   :  { %954 = vmatprep.subr.bf16.mxu0 %v2227_v28  ;;  %984 = vmatprep.mubr.bf16.mxu0 %v2510_v44  ;;  %v1957_v27 = vcombine.high %v1124_v23, %v1128_v24  ;;  %v1956_v28 = vcombine.low %v1124_v23, %v1128_v24  ;;  %v1157_v23 = vld [vmem:[#allocation10 + $0x148] sm:$0xff]  ;;  %v1982_v22 = vcombine.low %v1149_v17, %v1153_v18 }
  0xa2   :  { %2118 = vmatpush3.bf16.msra.mxu1 %v2246_v45  ;;  %2133 = vmatprep.mubr.msk.bf16.mxu1 %vm2512_vm0, %v2511_v46  ;;  %v1160_v45 = vld [vmem:[#allocation10 + $0x160] sm:$0xff]  ;;  %v1161_v19 = vld [vmem:[#allocation10 + $0x168] sm:$0xff] }
  0xa3   :  { %2119 = vmatprep.subr.bf16.mxu1 %v2511_v46  ;;  %v1991_v24 = vcombine.high %v1157_v23, %v1161_v19 }
  0xa4   :  { %955 = vmatpush1.bf16.msra.mxu0 %v2225_v29  ;;  %v1132_v29 = vld [vmem:[#allocation10 + $0x80] sm:$0xff] }
  0xa5   :  { %956 = vmatprep.subr.bf16.mxu0 %v2230_v31  ;;  %v1136_v31 = vld [vmem:[#allocation10 + $0xa0] sm:$0xff] }
  0xa6   :  { %2120 = vmatpush3.bf16.msra.mxu1 %v2247_v47 }
  0xa7   :  { %2121 = vmatprep.subr.bf16.mxu1 %v2511_v46 }
  0xa8   :  { %957 = vmatpush1.bf16.msra.mxu0 %v2228_v32  ;;  %v1965_v32 = vcombine.high %v1132_v29, %v1136_v31 }
  0xa9   :  { %958 = vmatprep.subr.bf16.mxu0 %v2233_v33  ;;  %v1964_v33 = vcombine.low %v1132_v29, %v1136_v31  ;;  %v1172_v31 = vld [vmem:[#allocation10 + $0x1c0] sm:$0xff] }
  0xaa   :  { %2122 = vmatpush3.bf16.msra.mxu1 %v2248_v11 }
  0xab   :  { %2123 = vmatprep.subr.bf16.mxu1 %v2511_v46 }
  0xac   :  { %959 = vmatpush1.bf16.msra.mxu0 %v2231_v34  ;;  %v1140_v34 = vld [vmem:[#allocation10 + $0xc0] sm:$0xff] }
  0xad   :  { %960 = vmatprep.subr.bf16.mxu0 %v2236_v36  ;;  %v1144_v36 = vld [vmem:[#allocation10 + $0xe0] sm:$0xff] }
  0xae   :  { %2124 = vmatpush3.bf16.msra.mxu1 %v2249_v12 }
  0xaf   :  { %2125 = vmatprep.subr.bf16.mxu1 %v2511_v46 }
  0xb0   :  { %961 = vmatpush1.bf16.msra.mxu0 %v2234_v37  ;;  %v1973_v37 = vcombine.high %v1140_v34, %v1144_v36 }
  0xb1   :  { %962 = vmatprep.subr.bf16.mxu0 %v2239_v38  ;;  %v1972_v38 = vcombine.low %v1140_v34, %v1144_v36  ;;  %v1177_v36 = vld [vmem:[#allocation10 + $0x1e8] sm:$0xff] }
  0xb2   :  { %2126 = vmatpush3.bf16.msra.mxu1 %v2250_v13  ;;  %v1141_v13 = vld [vmem:[#allocation10 + $0xc8] sm:$0xff] }
  0xb3   :  { %2127 = vmatprep.subr.bf16.mxu1 %v2511_v46 }
  0xb4   :  { %963 = vmatpush1.bf16.msra.mxu0 %v2237_v39  ;;  %v1148_v39 = vld [vmem:[#allocation10 + $0x100] sm:$0xff] }
  0xb5   :  { %964 = vmatprep.subr.bf16.mxu0 %v2242_v40  ;;  %v1152_v40 = vld [vmem:[#allocation10 + $0x120] sm:$0xff] }
  0xb6   :  { %2128 = vmatpush3.bf16.msra.mxu1 %v2251_v14  ;;  %v1145_v14 = vld [vmem:[#allocation10 + $0xe8] sm:$0xff] }
  0xb7   :  { %2129 = vmatprep.subr.bf16.mxu1 %v2511_v46 }
  0xb8   :  { %965 = vmatpush1.bf16.msra.mxu0 %v2240_v41  ;;  %v1981_v41 = vcombine.high %v1148_v39, %v1152_v40 }
  0xb9   :  { %966 = vmatprep.subr.bf16.mxu0 %v2245_v42  ;;  %v1980_v42 = vcombine.low %v1148_v39, %v1152_v40  ;;  %v1118_v40 = vld [vmem:[#allocation10 + $0x10] sm:$0xff] }
  0xba   :  { %2130 = vmatpush3.bf16.msra.mxu1 %v2252_v15 }
  0xbb   :  { %2131 = vmatprep.subr.bf16.mxu1 %v2511_v46 }
  0xbc   :  { %967 = vmatpush1.bf16.msra.mxu0 %v2243_v43  ;;  %v1156_v43 = vld [vmem:[#allocation10 + $0x140] sm:$0xff] }
  0xbd   :  { %1542 = vmatprep.subr.bf16.mxu0 %v1949_v21  ;;  %v1989_v46 = vcombine.high %v1156_v43, %v1160_v45  ;;  %v1988_v47 = vcombine.low %v1156_v43, %v1160_v45  ;;  %v1983_v21 = vcombine.high %v1149_v17, %v1153_v18  ;;  %v1150_v17 = vld [vmem:[#allocation10 + $0x110] sm:$0xff] }
  0xbe   :  { %2132 = vmatpush3.bf16.msra.mxu1 %v2253_v16  ;;  %v1975_v16 = vcombine.high %v1141_v13, %v1145_v14  ;;  %v1154_v18 = vld [vmem:[#allocation10 + $0x130] sm:$0xff] }
  0xbf   :  { %1583 = vmatprep.subr.bf16.mxu1 %v1951_v26  ;;  %v1169_v26 = vld [vmem:[#allocation10 + $0x1a8] sm:$0xff] }
 0x152   :  { %v2036_v48 = vpop.f32.mrb[0].mxu0 }
 0x153   :  { %v2037_v50 = vpop.f32.mrb[1].mxu0  ;;  %v2058_v51 = vpop.f32.mrb[0].mxu1 }
 0x154   :  { %v2038_v52 = vadd.f32 %v2037_v50, %v2036_v48  ;;  %v2039_v53 = vpop.f32.mrb[2].mxu0  ;;  %v2059_v54 = vpop.f32.mrb[1].mxu1  ;;  %v1164_v48 = vld [vmem:[#allocation10 + $0x180] sm:$0xff] }
 0x155   :  { %v2040_v55 = vpop.f32.mrb[3].mxu0  ;;  %v2060_v57 = vadd.f32 %v2059_v54, %v2058_v51  ;;  %v2061_v58 = vpop.f32.mrb[2].mxu1  ;;  %v860_v53 = vld [vmem:[%s2766_s5] sm:$0x3]  ;;  %v868_v54 = vsub.s32 1, %v2647_v30 }
 0x156   :  { %v717_v56 = vadd.f32 %v2038_v52, %v1858_v49  ;;  %v2062_v59 = vpop.f32.mrb[3].mxu1  ;;  %v1168_v49 = vld [vmem:[#allocation10 + $0x1a0] sm:$0xff]  ;;  %v864_v52 = vsub.s32 0, %v2647_v30 }
 0x157   :  { %v1997_v50 = vcombine.high %v1164_v48, %v1168_v49  ;;  %v1996_v51 = vcombine.low %v1164_v48, %v1168_v49  ;;  %v1939_v49 = vld [vmem:[%s2768_s7] ss:$0 sm:$0xff]  ;;  %s2513_s7 = smov [#allocation12]  }
 0x158   :  { %v757_v60 = vadd.f32 %v2060_v57, %v717_v56  ;;  %v865_v55 = vrot.slane %v860_v53, %v864_v52  ;;  %v869_v56 = vrot.slane %v860_v53, %v868_v54  ;;  %s1816_s25 = sshll.u32 %s2513_s7, 4  ;;  %s1817_s25 = int_to_ptr.vmem [resolvable:$true] %s1816_s25 }
 0x159   :  { %s2398_s27 = scalar_lea.vmem %s1817_s25, 32  ;;  %p2403_p13 = scmp.lt.s32.totalorder %s1817_s25, %s1817_s25 }
 0x15a   :  { %p2399_p12 = scmp.ne.s32.totalorder %s1817_s25, %s2398_s27  ;;  %p2404_p0 = scmp.lt.s32.totalorder %s2398_s27, %s2398_s27 }
 0x15c   :  { %p2405_p1 = por %p2404_p0, %p2403_p13 }
 0x15e   :  { %p2406_p2 = pnand %p2405_p1, %p2399_p12 }
 0x172   :  { %v2080_v61 = vpop.f32.mrb[4].mxu0 }
 0x173   :  { %v2081_v62 = vpop.f32.mrb[5].mxu0  ;;  %v2102_v63 = vpop.f32.mrb[4].mxu1 }
 0x174   :  { %v2082_v0 = vadd.f32 %v2081_v62, %v2080_v61  ;;  %v2083_v1 = vpop.f32.mrb[6].mxu0  ;;  %v2103_v2 = vpop.f32.mrb[5].mxu1 }
 0x175   :  { %v2084_v3 = vpop.f32.mrb[7].mxu0  ;;  %v2104_v5 = vadd.f32 %v2103_v2, %v2102_v63  ;;  %v2105_v6 = vpop.f32.mrb[6].mxu1  ;;  %v998_v1 = vld [vmem:[%s2762_s1] sm:$0x3] }
 0x176   :  { %v797_v4 = vadd.f32 %v2082_v0, %v757_v60  ;;  %v2106_v7 = vpop.f32.mrb[7].mxu1 }
 0x178   :  { %v837_v8 = vadd.f32 %v2104_v5, %v797_v4  ;;  %v1125_v4 = vld [vmem:[#allocation10 + $0x48] sm:$0xff] }
 0x179   :  { %v1129_v5 = vld [vmem:[#allocation10 + $0x68] sm:$0xff] }
 0x17a   :  { %v842_v9 = vmax.f32 %v837_v8, 0.0  ;;  %v1959_v8 = vcombine.high %v1125_v4, %v1129_v5  ;;  %v1958_v11 = vcombine.low %v1125_v4, %v1129_v5  ;;  %v1139_v4 = vld [vmem:[#allocation10 + $0xb8] sm:$0xff] }
 0x17c   :  { %v843_v10 = vpack.c.bf16 %v842_v9, %v842_v9  ;;  %v1133_v9 = vld [vmem:[#allocation10 + $0x88] sm:$0xff] }
 0x17e   :  { %985 = vmatmul.mubr.bf16.vlgmr.msra.gmra.mrb[8].mxu0 %v843_v10  ;;  %v1137_v10 = vld [vmem:[#allocation10 + $0xa8] sm:$0xff] }
 0x17f   :  { %1574 = vmatprep.mubr.bf16.mxu0 %v2510_v44  ;;  %1543 = vmatpush1.bf16.msra.mxu0 %v1948_v20  ;;  %v1967_v12 = vcombine.high %v1133_v9, %v1137_v10  ;;  %v1966_v15 = vcombine.low %v1133_v9, %v1137_v10  ;;  %v1974_v20 = vcombine.low %v1141_v13, %v1145_v14  ;;  %v1142_v9 = vld [vmem:[#allocation10 + $0xd0] sm:$0xff] }
 0x180   :  { %1544 = vmatprep.subr.bf16.mxu0 %v1957_v27  ;;  %v1990_v27 = vcombine.low %v1157_v23, %v1161_v19  ;;  %v1146_v10 = vld [vmem:[#allocation10 + $0xf0] sm:$0xff] }
 0x181   :  { %v1976_v23 = vcombine.low %v1142_v9, %v1146_v10 }
 0x183   :  { %1545 = vmatpush1.bf16.msra.mxu0 %v1956_v28 }
 0x184   :  { %1546 = vmatprep.subr.bf16.mxu0 %v1965_v32  ;;  %v1176_v32 = vld [vmem:[#allocation10 + $0x1e0] sm:$0xff] }
 0x185   :  { %v2005_v34 = vcombine.high %v1172_v31, %v1176_v32 }
 0x187   :  { %1547 = vmatpush1.bf16.msra.mxu0 %v1964_v33  ;;  %v1173_v33 = vld [vmem:[#allocation10 + $0x1c8] sm:$0xff] }
 0x188   :  { %1548 = vmatprep.subr.bf16.mxu0 %v1973_v37  ;;  %v2004_v37 = vcombine.low %v1172_v31, %v1176_v32  ;;  %v2007_v39 = vcombine.high %v1173_v33, %v1177_v36 }
 0x18b   :  { %1549 = vmatpush1.bf16.msra.mxu0 %v1972_v38  ;;  %v2006_v38 = vcombine.low %v1173_v33, %v1177_v36  ;;  %v1166_v33 = vld [vmem:[#allocation10 + $0x190] sm:$0xff]  ;;  %v1167_v36 = vld [vmem:[#allocation10 + $0x198] sm:$0xff] }
 0x18c   :  { %1550 = vmatprep.subr.bf16.mxu0 %v1981_v41  ;;  %v1122_v41 = vld [vmem:[#allocation10 + $0x30] sm:$0xff] }
 0x18d   :  { %v1952_v43 = vcombine.low %v1118_v40, %v1122_v41  ;;  %v1953_v45 = vcombine.high %v1118_v40, %v1122_v41 }
 0x18f   :  { %1551 = vmatpush1.bf16.msra.mxu0 %v1980_v42  ;;  %v1119_v42 = vld [vmem:[#allocation10 + $0x18] sm:$0xff] }
 0x190   :  { %1552 = vmatprep.subr.bf16.mxu0 %v1989_v46  ;;  %v1123_v46 = vld [vmem:[#allocation10 + $0x38] sm:$0xff] }
 0x191   :  { %v1955_v48 = vcombine.high %v1119_v42, %v1123_v46 }
 0x193   :  { %1553 = vmatpush1.bf16.msra.mxu0 %v1988_v47  ;;  %v1954_v47 = vcombine.low %v1119_v42, %v1123_v46  ;;  %v1174_v42 = vld [vmem:[#allocation10 + $0x1d0] sm:$0xff]  ;;  %v1179_v46 = vld [vmem:[#allocation10 + $0x1f8] sm:$0xff] }
 0x194   :  { %1554 = vmatprep.subr.bf16.mxu0 %v1997_v50 }
 0x197   :  { %1555 = vmatpush1.bf16.msra.mxu0 %v1996_v51 }
 0x198   :  { %1556 = vmatprep.subr.bf16.mxu0 %v2005_v34  ;;  %v1170_v34 = vld [vmem:[#allocation10 + $0x1b0] sm:$0xff] }
 0x199   :  { %v2001_v40 = vcombine.high %v1166_v33, %v1170_v34 }
 0x19b   :  { %1557 = vmatpush1.bf16.msra.mxu0 %v2004_v37  ;;  %v1171_v37 = vld [vmem:[#allocation10 + $0x1b8] sm:$0xff] }
 0x19c   :  { %1624 = vmatprep.subr.bf16.mxu0 %v1953_v45  ;;  %v2003_v41 = vcombine.high %v1167_v36, %v1171_v37  ;;  %v1175_v45 = vld [vmem:[#allocation10 + $0x1d8] sm:$0xff] }
 0x251   :  { %v986_v57 = vpop.f32.mrb[8].mxu0 }
 0x252   :  { %v987_v58 = vadd.f32 %v986_v57, %v865_v55  ;;  %v988_v59 = vpop.f32.mrb[9].mxu0  ;;  %v1126_v55 = vld [vmem:[#allocation10 + $0x50] sm:$0xff] }
 0x253   :  { %v989_v60 = vadd.f32 %v988_v59, %v869_v56  ;;  %v990_v61 = vpop.f32.mrb[10].mxu0  ;;  %v1130_v57 = vld [vmem:[#allocation10 + $0x70] sm:$0xff]  ;;  %v1131_v59 = vld [vmem:[#allocation10 + $0x78] sm:$0xff] }
 0x254   :  { %996 = vst [vmem:[#allocation11] sm:$0x3] %v987_v58  ;;  %v991_v62 = vpop.f32.mrb[11].mxu0  ;;  %v1960_v5 = vcombine.low %v1126_v55, %v1130_v57 }
 0x255   :  { %v993_v63 = vmul.f32 0.5, %v989_v60 }
 0x257   :  { %v994_v0 = vmul.f32 1.442695, %v993_v63  ;;  %v1961_v63 = vcombine.high %v1126_v55, %v1130_v57 }
 0x259   :  { %2254 = vpow2.f32 %v994_v0 }
 0x263   :  { %v2255_v2 = vpop.eup %2254 }
 0x264   :  { %997 = vst [vmem:[#allocation12] sm:$0x3] %v2255_v2  ;;  %v999_v3 = vmul.f32 %v2255_v2, %v998_v1  ;;  %v1134_v1 = vld [vmem:[#allocation10 + $0x90] sm:$0xff] }
 0x265   :  { %v1138_v2 = vld [vmem:[#allocation10 + $0xb0] sm:$0xff] }
 0x266   :  { %v1000_v6 = vadd.f32 %v999_v3, %v987_v58  ;;  %v1127_v58 = vld [vmem:[#allocation10 + $0x58] sm:$0xff]  ;;  %v1968_v13 = vcombine.low %v1134_v1, %v1138_v2 }
 0x267   :  { %v1963_v0 = vcombine.high %v1127_v58, %v1131_v59  ;;  %v1135_v3 = vld [vmem:[#allocation10 + $0x98] sm:$0xff] }
 0x268   :  { %v1002_v7 = vpack.c.bf16 %v1000_v6, %v1000_v6  ;;  %1001 = vst [vmem:[#allocation14] sm:$0x3] %v1000_v6  ;;  %v1962_v6 = vcombine.low %v1127_v58, %v1131_v59  ;;  %v1970_v14 = vcombine.low %v1135_v3, %v1139_v4 }
 0x26a   :  { %2134 = vmatmul.mubr.bf16.vlgmr.msra.gmra.mrb[8].mxu1 %v1002_v7  ;;  %v1969_v7 = vcombine.high %v1134_v1, %v1138_v2 }
 0x26b   :  { %1584 = vmatpush1.bf16.msra.mxu1 %v1950_v25  ;;  %1615 = vmatprep.mubr.bf16.mxu1 %v2510_v44  ;;  %v1165_v25 = vld [vmem:[#allocation10 + $0x188] sm:$0xff] }
 0x26c   :  { %1585 = vmatprep.subr.bf16.mxu1 %v1959_v8  ;;  %v1999_v28 = vcombine.high %v1165_v25, %v1169_v26  ;;  %v1998_v29 = vcombine.low %v1165_v25, %v1169_v26  ;;  %v1971_v8 = vcombine.high %v1135_v3, %v1139_v4  ;;  %v1162_v25 = vld [vmem:[#allocation10 + $0x170] sm:$0xff]  ;;  %v1159_v26 = vld [vmem:[#allocation10 + $0x158] sm:$0xff] }
 0x26f   :  { %1586 = vmatpush1.bf16.msra.mxu1 %v1958_v11  ;;  %v1143_v11 = vld [vmem:[#allocation10 + $0xd8] sm:$0xff] }
 0x270   :  { %1587 = vmatprep.subr.bf16.mxu1 %v1967_v12  ;;  %v1147_v12 = vld [vmem:[#allocation10 + $0xf8] sm:$0xff] }
 0x271   :  { %v1978_v19 = vcombine.low %v1143_v11, %v1147_v12 }
 0x273   :  { %1588 = vmatpush1.bf16.msra.mxu1 %v1966_v15  ;;  %v1977_v15 = vcombine.high %v1142_v9, %v1146_v10 }
 0x274   :  { %1589 = vmatprep.subr.bf16.mxu1 %v1975_v16  ;;  %v1979_v16 = vcombine.high %v1143_v11, %v1147_v12 }
 0x277   :  { %1590 = vmatpush1.bf16.msra.mxu1 %v1974_v20  ;;  %v1151_v20 = vld [vmem:[#allocation10 + $0x118] sm:$0xff] }
 0x278   :  { %1591 = vmatprep.subr.bf16.mxu1 %v1983_v21  ;;  %v1155_v21 = vld [vmem:[#allocation10 + $0x138] sm:$0xff] }
 0x27b   :  { %1592 = vmatpush1.bf16.msra.mxu1 %v1982_v22  ;;  %v1985_v22 = vcombine.high %v1150_v17, %v1154_v18 }
 0x27c   :  { %1593 = vmatprep.subr.bf16.mxu1 %v1991_v24  ;;  %v1158_v24 = vld [vmem:[#allocation10 + $0x150] sm:$0xff] }
 0x27d   :  { %v1993_v31 = vcombine.high %v1158_v24, %v1162_v25 }
 0x27f   :  { %1594 = vmatpush1.bf16.msra.mxu1 %v1990_v27  ;;  %v1163_v27 = vld [vmem:[#allocation10 + $0x178] sm:$0xff] }
 0x280   :  { %1595 = vmatprep.subr.bf16.mxu1 %v1999_v28  ;;  %v1984_v28 = vcombine.low %v1150_v17, %v1154_v18  ;;  %v1995_v32 = vcombine.high %v1159_v26, %v1163_v27 }
 0x283   :  { %1596 = vmatpush1.bf16.msra.mxu1 %v1998_v29  ;;  %v1986_v29 = vcombine.low %v1151_v20, %v1155_v21 }
 0x284   :  { %1597 = vmatprep.subr.bf16.mxu1 %v2007_v39  ;;  %v1994_v39 = vcombine.low %v1159_v26, %v1163_v27 }
 0x287   :  { %1598 = vmatpush1.bf16.msra.mxu1 %v2006_v38  ;;  %v1992_v38 = vcombine.low %v1158_v24, %v1162_v25 }
 0x288   :  { %1665 = vmatprep.subr.bf16.mxu1 %v1955_v48  ;;  %v2002_v48 = vcombine.low %v1167_v36, %v1171_v37 }
 0x33d   :  { %v1108_v50 = vpop.f32.mrb[8].mxu1 }
 0x33e   :  { %v1109_v51 = vadd.f32 %v1939_v49, %v1108_v50  ;;  %v2135_v53 = vpop.f32.mrb[9].mxu1  ;;  %v2011_v50 = vcombine.high %v1175_v45, %v1179_v46 }
 0x33f   :  { %v1111_v56 = vpop.f32.mrb[10].mxu1  ;;  %v2010_v53 = vcombine.low %v1175_v45, %v1179_v46 }
 0x340   :  { %v1114_v60 = vmax.f32 %v1109_v51, 0.0  ;;  %v2136_v61 = vpop.f32.mrb[11].mxu1 }
 0x342   :  { %v2688_v62 = vpack.c.bf16 %v1114_v60, %v1114_v60 }
 0x344   :  { %1575 = vmatmul.mubr.bf16.vlgmr.msra.gmra.mrb[12].mxu0 %v2688_v62  ;;  %1616 = vmatmul.mubr.bf16.vlgmr.msra.gmra.mrb[12].mxu1 %v2688_v62 }
 0x345   :  { %1625 = vmatpush1.bf16.msra.mxu0 %v1952_v43  ;;  %1666 = vmatpush1.bf16.msra.mxu1 %v1954_v47  ;;  %v1178_v43 = vld [vmem:[#allocation10 + $0x1f0] sm:$0xff]  ;;  %v2000_v47 = vcombine.low %v1166_v33, %v1170_v34 }
 0x346   :  { %1626 = vmatprep.subr.bf16.mxu0 %v1961_v63  ;;  %1667 = vmatprep.subr.bf16.mxu1 %v1963_v0  ;;  %v2009_v49 = vcombine.high %v1174_v42, %v1178_v43  ;;  %v2008_v51 = vcombine.low %v1174_v42, %v1178_v43 }
 0x347   :  { %1656 = vmatprep.mubr.bf16.mxu0 %v2510_v44  ;;  %1697 = vmatprep.mubr.bf16.mxu1 %v2510_v44  ;;  %v1987_v44 = vcombine.high %v1151_v20, %v1155_v21 }
 0x349   :  { %1627 = vmatpush1.bf16.msra.mxu0 %v1960_v5  ;;  %1668 = vmatpush1.bf16.msra.mxu1 %v1962_v6 }
 0x34a   :  { %1628 = vmatprep.subr.bf16.mxu0 %v1969_v7  ;;  %1669 = vmatprep.subr.bf16.mxu1 %v1971_v8 }
 0x34d   :  { %1629 = vmatpush1.bf16.msra.mxu0 %v1968_v13  ;;  %1670 = vmatpush1.bf16.msra.mxu1 %v1970_v14 }
 0x34e   :  { %1630 = vmatprep.subr.bf16.mxu0 %v1977_v15  ;;  %1671 = vmatprep.subr.bf16.mxu1 %v1979_v16 }
 0x351   :  { %1631 = vmatpush1.bf16.msra.mxu0 %v1976_v23  ;;  %1672 = vmatpush1.bf16.msra.mxu1 %v1978_v19 }
 0x352   :  { %1632 = vmatprep.subr.bf16.mxu0 %v1985_v22  ;;  %1673 = vmatprep.subr.bf16.mxu1 %v1987_v44 }
 0x355   :  { %1633 = vmatpush1.bf16.msra.mxu0 %v1984_v28  ;;  %1674 = vmatpush1.bf16.msra.mxu1 %v1986_v29 }
 0x356   :  { %1634 = vmatprep.subr.bf16.mxu0 %v1993_v31  ;;  %1675 = vmatprep.subr.bf16.mxu1 %v1995_v32 }
 0x359   :  { %1635 = vmatpush1.bf16.msra.mxu0 %v1992_v38  ;;  %1676 = vmatpush1.bf16.msra.mxu1 %v1994_v39 }
 0x35a   :  { %1636 = vmatprep.subr.bf16.mxu0 %v2001_v40  ;;  %1677 = vmatprep.subr.bf16.mxu1 %v2003_v41 }
 0x35d   :  { %1637 = vmatpush1.bf16.msra.mxu0 %v2000_v47  ;;  %1678 = vmatpush1.bf16.msra.mxu1 %v2002_v48 }
 0x35e   :  { %1638 = vmatprep.subr.bf16.mxu0 %v2009_v49  ;;  %1679 = vmatprep.subr.bf16.mxu1 %v2011_v50 }
 0x361   :  { %1639 = vmatpush1.bf16.msra.mxu0 %v2008_v51  ;;  %1680 = vmatpush1.bf16.msra.mxu1 %v2010_v53 }
 0x364   :  { %1657 = vmatmul.mubr.bf16.vlgmr.msra.gmra.mrb[16].mxu0 %v2688_v62  ;;  %1698 = vmatmul.mubr.bf16.vlgmr.msra.gmra.mrb[16].mxu1 %v2688_v62 }
 0x365   :  { %2409 = shalt.err (!%p2406_p2)
}
 0x366   :  { %s2410_s30 = scalar_lea.hbm %s2772_s11, 32 }
 0x367   :  { %p2411_p3 = scmp.ne.s32.totalorder %s2772_s11, %s2410_s30  ;;  %p2414_p4 = scmp.lt.u32.totalorder %s2410_s30, %s2772_s11 }
 0x369   :  { %p2416_p5 = pnand %p2414_p4, %p2411_p3 }
 0x36b   :  { %2419 = shalt.err (!%p2416_p5)
}
 0x36c   :  { %1819 = dma.vmem_to_hbm [thread:$0]  %s1817_s25, 32, %s2772_s11, [#allocation13]  }
 0x36d   :  { %s2420_s4 = scalar_lea.vmem %s1807_s24, 32  ;;  %p2425_p7 = scmp.lt.s32.totalorder %s1807_s24, %s1807_s24 }
 0x36e   :  { %p2421_p6 = scmp.ne.s32.totalorder %s1807_s24, %s2420_s4  ;;  %p2426_p8 = scmp.lt.s32.totalorder %s2420_s4, %s2420_s4 }
 0x370   :  { %p2427_p9 = por %p2426_p8, %p2425_p7 }
 0x372   :  { %p2428_p10 = pnand %p2427_p9, %p2421_p6 }
 0x374   :  { %2431 = shalt.err (!%p2428_p10)
}
 0x375   :  { %s2432_s26 = scalar_lea.hbm %s2771_s10, 32 }
 0x376   :  { %p2433_p11 = scmp.ne.s32.totalorder %s2771_s10, %s2432_s26  ;;  %p2436_p12 = scmp.lt.u32.totalorder %s2432_s26, %s2771_s10 }
 0x378   :  { %p2438_p13 = pnand %p2436_p12, %p2433_p11 }
 0x37a   :  { %2441 = shalt.err (!%p2438_p13)
}
 0x37b   :  { %1809 = dma.vmem_to_hbm [thread:$0]  %s1807_s24, 32, %s2771_s10, [#allocation4]  }
 0x37c   :  { %s2515_s5 = smov [#allocation14]  }
 0x37d   :  { %s1826_s1 = sshll.u32 %s2515_s5, 4  ;;  %s1827_s1 = int_to_ptr.vmem [resolvable:$true] %s1826_s1 }
 0x37e   :  { %s2442_s0 = scalar_lea.vmem %s1827_s1, 32  ;;  %p2447_p1 = scmp.lt.s32.totalorder %s1827_s1, %s1827_s1 }
 0x37f   :  { %p2443_p0 = scmp.ne.s32.totalorder %s1827_s1, %s2442_s0  ;;  %p2448_p2 = scmp.lt.s32.totalorder %s2442_s0, %s2442_s0 }
 0x381   :  { %p2449_p3 = por %p2448_p2, %p2447_p1 }
 0x383   :  { %p2450_p4 = pnand %p2449_p3, %p2443_p0 }
 0x385   :  { %2453 = shalt.err (!%p2450_p4)
}
 0x386   :  { %s2454_s22 = scalar_lea.hbm %s2773_s12, 32 }
 0x387   :  { %p2455_p5 = scmp.ne.s32.totalorder %s2773_s12, %s2454_s22  ;;  %p2458_p6 = scmp.lt.u32.totalorder %s2454_s22, %s2773_s12 }
 0x389   :  { %p2460_p7 = pnand %p2458_p6, %p2455_p5 }
 0x38b   :  { %2463 = shalt.err (!%p2460_p7)
}
 0x38c   :  { %1829 = dma.vmem_to_hbm [thread:$0]  %s1827_s1, 32, %s2773_s12, [#allocation13]   ;;  %v1192_v55 = vsub.s32 2, %v2647_v30  ;;  %v1180_v56 = vld [vmem:[%s2770_s9] sm:$0xff]  ;;  %v1196_v57 = vsub.s32 3, %v2647_v30  ;;  %v1200_v21 = vsub.s32 4, %v2647_v30 }
 0x38d   :  { %v1185_v58 = vrot.slane %v1180_v56, %v864_v52  ;;  %v1189_v60 = vrot.slane %v1180_v56, %v868_v54  ;;  %v1208_v23 = vsub.s32 6, %v2647_v30  ;;  %v1204_v19 = vsub.s32 5, %v2647_v30  ;;  %s2516_s9 = smov [#allocation15]  }
 0x38e   :  { %v1193_v59 = vrot.slane %v1180_v56, %v1192_v55  ;;  %v1197_v61 = vrot.slane %v1180_v56, %v1196_v57  ;;  %v1212_v22 = vsub.s32 7, %v2647_v30  ;;  %v1201_v25 = vrot.slane %v1180_v56, %v1200_v21  ;;  %s1836_s12 = sshll.u32 %s2516_s9, 4  ;;  %s1837_s12 = int_to_ptr.vmem [resolvable:$true] %s1836_s12 }
 0x38f   :  { %v1209_v26 = vrot.slane %v1180_v56, %v1208_v23  ;;  %v1205_v28 = vrot.slane %v1180_v56, %v1204_v19  ;;  %s2464_s19 = scalar_lea.vmem %s1837_s12, 256  ;;  %p2469_p9 = scmp.lt.s32.totalorder %s1837_s12, %s1837_s12 }
 0x390   :  { %v1213_v29 = vrot.slane %v1180_v56, %v1212_v22  ;;  %p2465_p8 = scmp.ne.s32.totalorder %s1837_s12, %s2464_s19  ;;  %p2470_p10 = scmp.lt.s32.totalorder %s2464_s19, %s2464_s19 }
 0x392   :  { %p2471_p11 = por %p2470_p10, %p2469_p9 }
 0x394   :  { %p2472_p12 = pnand %p2471_p11, %p2465_p8 }
 0x417   :  { %v1576_v62 = vpop.f32.mrb[12].mxu0  ;;  %v1617_v63 = vpop.f32.mrb[12].mxu1 }
 0x418   :  { %v1577_v0 = vadd.f32 %v1576_v62, %v1185_v58  ;;  %v1618_v1 = vadd.f32 %v1617_v63, %v1193_v59  ;;  %v1578_v2 = vpop.f32.mrb[13].mxu0  ;;  %v1619_v3 = vpop.f32.mrb[13].mxu1 }
 0x419   :  { %v1579_v4 = vadd.f32 %v1578_v2, %v1189_v60  ;;  %v1620_v5 = vadd.f32 %v1619_v3, %v1197_v61  ;;  %v1580_v6 = vpop.f32.mrb[14].mxu0  ;;  %v1621_v7 = vpop.f32.mrb[14].mxu1 }
 0x41a   :  { %v2012_v8 = vmul.f32 -1.442695, %v1577_v0  ;;  %v2014_v9 = vmul.f32 -1.442695, %v1618_v1  ;;  %v1581_v10 = vpop.f32.mrb[15].mxu0  ;;  %v1622_v11 = vpop.f32.mrb[15].mxu1 }
 0x41b   :  { %v2013_v52 = vmul.f32 -1.442695, %v1579_v4  ;;  %v2015_v12 = vmul.f32 -1.442695, %v1620_v5 }
 0x41c   :  { %2256 = vpow2.f32 %v2012_v8 }
 0x41d   :  { %2258 = vpow2.f32 %v2014_v9 }
 0x41e   :  { %2260 = vpow2.f32 %v2013_v52 }
 0x41f   :  { %2262 = vpow2.f32 %v2015_v12 }
 0x426   :  { %v2257_v54 = vpop.eup %2256 }
 0x427   :  { %v2259_v13 = vpop.eup %2258  ;;  %v1730_v14 = vadd.f32 1.0, %v2257_v54 }
 0x428   :  { %v2261_v15 = vpop.eup %2260  ;;  %v1732_v16 = vadd.f32 1.0, %v2259_v13 }
 0x429   :  { %v2263_v17 = vpop.eup %2262  ;;  %2264 = vrcp.f32 %v1730_v14  ;;  %v1731_v18 = vadd.f32 1.0, %v2261_v15 }
 0x42a   :  { %2266 = vrcp.f32 %v1732_v16  ;;  %v1733_v20 = vadd.f32 1.0, %v2263_v17 }
 0x42b   :  { %2268 = vrcp.f32 %v1731_v18 }
 0x42c   :  { %2270 = vrcp.f32 %v1733_v20 }
 0x433   :  { %v2265_v44 = vpop.eup %2264 }
 0x434   :  { %v2267_v24 = vpop.eup %2266 }
 0x435   :  { %v2269_v27 = vpop.eup %2268 }
 0x436   :  { %v2271_v31 = vpop.eup %2270  ;;  %v1762_v32 = vcombine.low %v2265_v44, %v2269_v27 }
 0x437   :  { %v1658_v33 = vpop.f32.mrb[16].mxu0  ;;  %v1699_v34 = vpop.f32.mrb[16].mxu1  ;;  %v1763_v36 = vcombine.low %v2267_v24, %v2271_v31 }
 0x438   :  { %v1659_v37 = vadd.f32 %v1658_v33, %v1201_v25  ;;  %v1700_v38 = vadd.f32 %v1699_v34, %v1209_v26  ;;  %v1660_v39 = vpop.f32.mrb[17].mxu0  ;;  %v1701_v40 = vpop.f32.mrb[17].mxu1  ;;  %v1770_v41 = vrot.slane %v1762_v32, %v2650_v35 }
 0x439   :  { %v1661_v42 = vadd.f32 %v1660_v39, %v1205_v28  ;;  %v1702_v30 = vadd.f32 %v1701_v40, %v1213_v29  ;;  %v1662_v43 = vpop.f32.mrb[18].mxu0  ;;  %v1703_v45 = vpop.f32.mrb[18].mxu1  ;;  %v1777_v46 = vrot.slane %v1763_v36, %v2650_v35 }
 0x43a   :  { %v2016_v47 = vmul.f32 -1.442695, %v1659_v37  ;;  %v2018_v48 = vmul.f32 -1.442695, %v1700_v38  ;;  %v1663_v49 = vpop.f32.mrb[19].mxu0  ;;  %v1704_v50 = vpop.f32.mrb[19].mxu1 }
 0x43b   :  { %v2017_v51 = vmul.f32 -1.442695, %v1661_v42  ;;  %v2019_v53 = vmul.f32 -1.442695, %v1702_v30  ;;  %v1778_v55 = vcombine.low %v1770_v41, %v1777_v46 }
 0x43c   :  { %2272 = vpow2.f32 %v2016_v47 }
 0x43d   :  { %2274 = vpow2.f32 %v2018_v48  ;;  %1798 = vst [vmem:[#allocation15] sm:$0xff] %v1778_v55 }
 0x43e   :  { %2276 = vpow2.f32 %v2017_v51 }
 0x43f   :  { %2278 = vpow2.f32 %v2019_v53 }
 0x446   :  { %v2273_v56 = vpop.eup %2272 }
 0x447   :  { %v2275_v57 = vpop.eup %2274  ;;  %v1734_v58 = vadd.f32 1.0, %v2273_v56 }
 0x448   :  { %v2277_v59 = vpop.eup %2276  ;;  %v1736_v60 = vadd.f32 1.0, %v2275_v57 }
 0x449   :  { %v2279_v61 = vpop.eup %2278  ;;  %2280 = vrcp.f32 %v1734_v58  ;;  %v1735_v62 = vadd.f32 1.0, %v2277_v59 }
 0x44a   :  { %2282 = vrcp.f32 %v1736_v60  ;;  %v1737_v63 = vadd.f32 1.0, %v2279_v61 }
 0x44b   :  { %2284 = vrcp.f32 %v1735_v62 }
 0x44c   :  { %2286 = vrcp.f32 %v1737_v63 }
 0x453   :  { %v2281_v0 = vpop.eup %2280 }
 0x454   :  { %v2283_v1 = vpop.eup %2282 }
 0x455   :  { %v2285_v2 = vpop.eup %2284 }
 0x456   :  { %v2287_v3 = vpop.eup %2286  ;;  %v1779_v4 = vcombine.low %v2281_v0, %v2285_v2 }
 0x457   :  { %v1780_v5 = vcombine.low %v2283_v1, %v2287_v3 }
 0x458   :  { %v1787_v6 = vrot.slane %v1779_v4, %v2650_v35 }
 0x459   :  { %v1794_v7 = vrot.slane %v1780_v5, %v2650_v35 }
 0x45b   :  { %v1795_v8 = vcombine.low %v1787_v6, %v1794_v7 }
 0x45d   :  { %1799 = vst [vmem:[#allocation15 + $0x8] sm:$0xff] %v1795_v8 }
 0x45e   :  { %2475 = shalt.err (!%p2472_p12)
}
 0x45f   :  { %s2476_s16 = scalar_lea.hbm %s2774_s13, 256 }
 0x460   :  { %p2477_p13 = scmp.ne.s32.totalorder %s2774_s13, %s2476_s16  ;;  %p2480_p0 = scmp.lt.u32.totalorder %s2476_s16, %s2774_s13 }
 0x462   :  { %p2482_p1 = pnand %p2480_p0, %p2477_p13 }
 0x464   :  { %2485 = shalt.err (!%p2482_p1)
}
 0x465   :  { %1839 = dma.vmem_to_hbm [thread:$0]  %s1837_s12, 256, %s2774_s13, [#allocation16]  }
 0x466   :  { %2492 = dma.done.wait [#allocation4], 32  }
 0x467   :  { %2493 = vsyncadd [#allocation4], 4294967264 }
 0x468   :  { %2494 = dma.done.wait [#allocation13], 64  }
 0x469   :  { %2495 = vsyncadd [#allocation13], 4294967232 }
 0x46a   :  { %2496 = dma.done.wait [#allocation16], 256  }
 0x46b   :  { %2497 = vsyncadd [#allocation16], 4294967040 }
 0x46c   :  { %1852 = vsyncpa [#allocation3], 1 }
 0x46d   :  { %1853 = vsyncpa [#allocation6], 1 }
 0x46e   :  { %1854 = vsyncpa [#allocation9], 1 }
 0x46f   :  { %1855 = vsyncpa [#allocation4], 1 }
 0x470   :  { %1856 = vsyncpa [#allocation13], 1 }
 0x471   :  { %1857 = vsyncpa [#allocation16], 1 }

</bundles_post_ra>
